<compile_context>
chip_gen: v7x
topology: tpu7x:2x2x1
jax: 0.10.0
libtpu: 0.0.40
codegen_flags: <defaults>
</compile_context>

<pallas_src>
import jax
import jax.numpy as jnp
from jax.experimental import pallas as pl
from jax.experimental.pallas import tpu as pltpu

HIDDEN = 16          # hidden_size (module default)
MAX_LENGTH = 10      # LangDef.max_words
OUTPUT_SIZE = 20     # output_size (vocab)
N_LAYERS = 1

# ---- packed weight-slab column layout (single (2H, 128) f32 array) ----------
SLAB_W = 128
ATTN_OFF = 0                                  # width MAX_LENGTH
COMB_OFF = ATTN_OFF + MAX_LENGTH              # width HIDDEN
GATE_OFF = COMB_OFF + HIDDEN                  # width 4*HIDDEN  [r | z | n_i | n_h]
OUT_OFF = GATE_OFF + 4 * HIDDEN               # width OUTPUT_SIZE (rows 0:H only)
SLAB_USED = OUT_OFF + OUTPUT_SIZE             # = 110 <= 128

# ---- packed per-step output row layout (one (1, 128) f32 row per step) ------
OUT_PAD = 128
ROW_LOGP = 0
ROW_HID = ROW_LOGP + OUTPUT_SIZE
ROW_ATTN = ROW_HID + HIDDEN
ROW_USED = ROW_ATTN + MAX_LENGTH              # = 46


def _decoder_seq_kernel(tok_ref,                       # scalar-prefetch (SMEM): (T,) int32
                        emb_ref, hid0_ref, enc_ref,    # VMEM inputs
                        w_ref, b_ref,
                        out_ref,                       # VMEM output (T, 128), resident
                        hid_sc):                       # VMEM scratch: hidden carry (1, H)
    H, L, V = HIDDEN, MAX_LENGTH, OUTPUT_SIZE
    t = pl.program_id(0)

    # initialize the hidden-state carry from the caller's hidden on step 0
    @pl.when(t == 0)
    def _():
        hid_sc[...] = hid0_ref[...]

    W = w_ref[...]                                     # (2H, 128) weight slab
    B = b_ref[...]                                     # (1, 128) bias row

    # embedded = embedding(input)  (dropout == identity in eval mode)
    idx = tok_ref[t]                                   # already clamped host-side
    embedded = emb_ref[pl.ds(idx, 1), :]               # (1, H)
    h = hid_sc[...]                                    # (1, H)

    # attn_weights = softmax(attn(cat(embedded, hidden)))  -- one stacked matmul
    eh = jnp.concatenate([embedded, h], axis=-1)       # (1, 2H)
    attn_logits = (jnp.dot(eh, W[:, ATTN_OFF:ATTN_OFF + L],
                           preferred_element_type=jnp.float32)
                   + B[:, ATTN_OFF:ATTN_OFF + L])      # (1, L)
    am = jnp.max(attn_logits, axis=-1, keepdims=True)
    ae = jnp.exp(attn_logits - am)
    attn_w = ae * pl.reciprocal(jnp.sum(ae, axis=-1, keepdims=True), approx=False)

    # attn_applied = bmm(attn_weights, encoder_outputs)
    attn_applied = jnp.dot(attn_w, enc_ref[...],
                           preferred_element_type=jnp.float32)       # (1, H)

    # output = attn_combine(cat(embedded, attn_applied))  -- one stacked matmul
    ea = jnp.concatenate([embedded, attn_applied], axis=-1)          # (1, 2H)
    combined = (jnp.dot(ea, W[:, COMB_OFF:COMB_OFF + H],
                        preferred_element_type=jnp.float32)
                + B[:, COMB_OFF:COMB_OFF + H])                       # (1, H)

    x = combined
    for _ in range(N_LAYERS):                          # n_layers = 1 (static)
        x = jnp.maximum(x, 0.0)                        # F.relu
        # GRU cell: single stacked matmul, output columns [r | z | n_i | n_h]
        xh = jnp.concatenate([x, h], axis=-1)          # (1, 2H)
        gates = (jnp.dot(xh, W[:, GATE_OFF:GATE_OFF + 4 * H],
                         preferred_element_type=jnp.float32)
                 + B[:, GATE_OFF:GATE_OFF + 4 * H])    # (1, 4H)
        rz = jax.nn.sigmoid(gates[:, :2 * H])          # one sigmoid over [r|z]
        r = rz[:, :H]
        z = rz[:, H:2 * H]
        n = jnp.tanh(gates[:, 2 * H:3 * H] + r * gates[:, 3 * H:4 * H])
        h = (1.0 - z) * n + z * h
        x = h                                          # GRU output == new hidden

    hid_sc[...] = h                                    # carry to next grid step

    # output = log_softmax(out(output[0]))
    logits = (jnp.dot(h, W[:H, OUT_OFF:OUT_OFF + V],
                      preferred_element_type=jnp.float32)
              + B[:, OUT_OFF:OUT_OFF + V])             # (1, V)
    lm = jnp.max(logits, axis=-1, keepdims=True)
    lse = jnp.log(jnp.sum(jnp.exp(logits - lm), axis=-1, keepdims=True)) + lm
    logp = logits - lse

    # pack [log_probs | new_hidden | attn_weights | 0-pad] into one lane-dense row
    # and store it into row t of the VMEM-resident output block (single final
    # writeback DMA for the whole sequence).
    row = jnp.concatenate(
        [logp, h, attn_w, jnp.zeros((1, OUT_PAD - ROW_USED), jnp.float32)], axis=-1)
    out_ref[pl.ds(t, 1), :] = row


def attention_decoder_gru_decode(packed, tokens, hidden0, encoder_outputs):
    """Run T teacher-forced decode steps in ONE pallas_call.

    tokens:          int32 (T,)
    hidden0:         f32 (1, 1, H)
    encoder_outputs: f32 (max_length, H)
    returns (log_probs (T, V), hiddens (T, H), attn_weights (T, max_length))
    """
    H, L, V = HIDDEN, MAX_LENGTH, OUTPUT_SIZE
    T = int(tokens.shape[0])
    hid2d = hidden0.reshape(1, H).astype(jnp.float32)
    # clamp token ids host-side so the kernel's gather can never go OOB
    tok = jnp.clip(tokens.astype(jnp.int32), 0, V - 1)

    flops = T * 2 * (2 * H * L + L * H + 2 * H * H + 2 * H * 4 * H + H * V)
    transcendentals = T * (L + V + 3 * H + 2)
    bytes_accessed = 4 * (packed["embedding"].size + encoder_outputs.size + H
                          + packed["wslab"].size + packed["bslab"].size
                          + T + T * OUT_PAD)

    out = pl.pallas_call(
        _decoder_seq_kernel,
        out_shape=jax.ShapeDtypeStruct((T, OUT_PAD), jnp.float32),
        grid_spec=pltpu.PrefetchScalarGridSpec(
            num_scalar_prefetch=1,
            grid=(T,),
            in_specs=[
                # constant block index across t -> each input DMA'd into VMEM once
                pl.BlockSpec((V, H), lambda t, tok: (0, 0)),           # embedding
                pl.BlockSpec((1, H), lambda t, tok: (0, 0)),           # initial hidden
                pl.BlockSpec((L, H), lambda t, tok: (0, 0)),           # encoder_outputs
                pl.BlockSpec((2 * H, SLAB_W), lambda t, tok: (0, 0)),  # weight slab
                pl.BlockSpec((1, SLAB_W), lambda t, tok: (0, 0)),      # bias row
            ],
            # constant block index -> output block resident in VMEM for all T
            # steps; Pallas writes it back to HBM once after the last step.
            out_specs=pl.BlockSpec((T, OUT_PAD), lambda t, tok: (0, 0)),
            scratch_shapes=[pltpu.VMEM((1, H), jnp.float32)],          # hidden carry
        ),
        compiler_params=pltpu.CompilerParams(
            dimension_semantics=("arbitrary",)),      # sequential: hidden carry
        cost_estimate=pl.CostEstimate(flops=flops,
                                      transcendentals=transcendentals,
                                      bytes_accessed=bytes_accessed),
    )(tok,
      packed["embedding"], hid2d, encoder_outputs,
      packed["wslab"], packed["bslab"])

    log_probs = out[:, ROW_LOGP:ROW_LOGP + V]
    hiddens = out[:, ROW_HID:ROW_HID + H]
    attn_weights = out[:, ROW_ATTN:ROW_ATTN + L]
    return log_probs, hiddens, attn_weights


def attention_decoder_gru_forward(packed, token, hidden, encoder_output, encoder_outputs):
    """Single-step API matching AttentionDecoderGRU.forward (T=1)."""
    del encoder_output  # unused by the reference forward
    logp, hids, attn = attention_decoder_gru_decode(packed, token, hidden, encoder_outputs)
    return logp, hids[-1].reshape(1, 1, HIDDEN), attn


# --------------------------- parameters / packing ----------------------------

def init_params(key):
    H, L, V = HIDDEN, MAX_LENGTH, OUTPUT_SIZE
    ks = jax.random.split(key, 12)
    s = 0.1
    return {
        "embedding": jax.random.normal(ks[0], (V, H), jnp.float32) * s,
        # attn: Linear(2H -> L), split into embedded / hidden halves, pre-transposed
        "attn_we": jax.random.normal(ks[1], (H, L), jnp.float32) * s,
        "attn_wh": jax.random.normal(ks[2], (H, L), jnp.float32) * s,
        "attn_b": jax.random.normal(ks[3], (1, L), jnp.float32) * s,
        # attn_combine: Linear(2H -> H), split into embedded / attn_applied halves
        "comb_we": jax.random.normal(ks[4], (H, H), jnp.float32) * s,
        "comb_wa": jax.random.normal(ks[5], (H, H), jnp.float32) * s,
        "comb_b": jax.random.normal(ks[6], (1, H), jnp.float32) * s,
        # GRU: weights pre-transposed to (H, 3H), gate order [r, z, n]
        "w_ih": jax.random.normal(ks[7], (H, 3 * H), jnp.float32) * s,
        "b_ih": jax.random.normal(ks[8], (1, 3 * H), jnp.float32) * s,
        "w_hh": jax.random.normal(ks[9], (H, 3 * H), jnp.float32) * s,
        "b_hh": jax.random.normal(ks[10], (1, 3 * H), jnp.float32) * s,
        # out: Linear(H -> V)
        "out_w": jax.random.normal(ks[11], (H, V), jnp.float32) * s,
        "out_b": jnp.zeros((1, V), jnp.float32),
    }


def pack_params(p):
    """Pack all Linears/GRU weights into one (2H,128) slab + one (1,128) bias row."""
    H, L, V = HIDDEN, MAX_LENGTH, OUTPUT_SIZE
    W = jnp.zeros((2 * H, SLAB_W), jnp.float32)
    B = jnp.zeros((1, SLAB_W), jnp.float32)

    # attn: cat(emb, h) @ [attn_we ; attn_wh]
    W = W.at[:, ATTN_OFF:ATTN_OFF + L].set(
        jnp.concatenate([p["attn_we"], p["attn_wh"]], axis=0))
    B = B.at[:, ATTN_OFF:ATTN_OFF + L].set(p["attn_b"])

    # attn_combine: cat(emb, attn_applied) @ [comb_we ; comb_wa]
    W = W.at[:, COMB_OFF:COMB_OFF + H].set(
        jnp.concatenate([p["comb_we"], p["comb_wa"]], axis=0))
    B = B.at[:, COMB_OFF:COMB_OFF + H].set(p["comb_b"])

    # GRU gates: cat(x, h) @ stacked weight, output columns [r | z | n_i | n_h]
    w_ih, w_hh = p["w_ih"], p["w_hh"]                  # (H, 3H) each, [r, z, n]
    b_ih, b_hh = p["b_ih"], p["b_hh"]                  # (1, 3H)
    zeros_hh = jnp.zeros((H, H), jnp.float32)
    top = jnp.concatenate([w_ih[:, :2 * H], w_ih[:, 2 * H:], zeros_hh], axis=1)   # x rows
    bot = jnp.concatenate([w_hh[:, :2 * H], zeros_hh, w_hh[:, 2 * H:]], axis=1)   # h rows
    W = W.at[:, GATE_OFF:GATE_OFF + 4 * H].set(jnp.concatenate([top, bot], axis=0))
    gate_b = jnp.concatenate(
        [b_ih[:, :2 * H] + b_hh[:, :2 * H], b_ih[:, 2 * H:], b_hh[:, 2 * H:]], axis=1)
    B = B.at[:, GATE_OFF:GATE_OFF + 4 * H].set(gate_b)

    # out: Linear(H -> V), only the top H rows are used by the kernel
    W = W.at[:H, OUT_OFF:OUT_OFF + V].set(p["out_w"])
    B = B.at[:, OUT_OFF:OUT_OFF + V].set(p["out_b"])
    return W, B


# ------------------------------ pure-JAX reference ---------------------------

def reference_forward(params, token, hidden, encoder_outputs):
    """Pure-JAX single-step reference matching the PyTorch forward semantics."""
    H = HIDDEN
    embedded = params["embedding"][token[0]][None, :]                    # (1, H)
    hid = hidden.reshape(1, H)
    attn_logits = embedded @ params["attn_we"] + hid @ params["attn_wh"] + params["attn_b"]
    attn_weights = jax.nn.softmax(attn_logits, axis=-1)
    attn_applied = attn_weights @ encoder_outputs
    combined = (embedded @ params["comb_we"] + attn_applied @ params["comb_wa"]
                + params["comb_b"])
    x, h = combined, hid
    for _ in range(N_LAYERS):
        x = jnp.maximum(x, 0.0)
        gi = x @ params["w_ih"] + params["b_ih"]
        gh = h @ params["w_hh"] + params["b_hh"]
        r = jax.nn.sigmoid(gi[:, :H] + gh[:, :H])
        z = jax.nn.sigmoid(gi[:, H:2 * H] + gh[:, H:2 * H])
        n = jnp.tanh(gi[:, 2 * H:] + r * gh[:, 2 * H:])
        h = (1.0 - z) * n + z * h
        x = h
    logits = x @ params["out_w"] + params["out_b"]
    return jax.nn.log_softmax(logits, axis=-1), h.reshape(1, 1, H), attn_weights


def reference_decode(params, tokens, hidden, encoder_outputs):
    logps, attns = [], []
    h = hidden
    for t in range(tokens.shape[0]):
        logp, h, aw = reference_forward(params, tokens[t:t + 1], h, encoder_outputs)
        logps.append(logp)
        attns.append(aw)
    return jnp.concatenate(logps, axis=0), h, jnp.concatenate(attns, axis=0)


if __name__ == "__main__":
    key = jax.random.PRNGKey(0)
    pkey, hkey, ekey = jax.random.split(key, 3)

    params = init_params(pkey)
    wslab, bslab = pack_params(params)
    packed = {"embedding": params["embedding"], "wslab": wslab, "bslab": bslab}

    tokens = jnp.array([3, 7, 1, 19], dtype=jnp.int32)                   # T = 4 decode steps
    hidden = jax.random.normal(hkey, (1, 1, HIDDEN), jnp.float32) * 0.1  # GRU hidden
    encoder_outputs = jax.random.normal(ekey, (MAX_LENGTH, HIDDEN), jnp.float32) * 0.1
    encoder_output = encoder_outputs[-1:]                                # unused, as in PyTorch

    # fused multi-step decode (one pallas_call for all T steps)
    log_probs, hiddens, attn_weights = attention_decoder_gru_decode(
        packed, tokens, hidden, encoder_outputs)
    jax.block_until_ready((log_probs, hiddens, attn_weights))

    # check against pure-JAX step-by-step reference
    r_logp, r_hid, r_attn = reference_decode(params, tokens, hidden, encoder_outputs)
    assert jnp.allclose(log_probs, r_logp, atol=1e-5), "log_probs mismatch"
    assert jnp.allclose(hiddens[-1].reshape(1, 1, HIDDEN), r_hid, atol=1e-5), "hidden mismatch"
    assert jnp.allclose(attn_weights, r_attn, atol=1e-5), "attn_weights mismatch"

    # single-step API parity with the original PyTorch forward
    lp1, h1, a1 = attention_decoder_gru_forward(
        packed, tokens[:1], hidden, encoder_output, encoder_outputs)
    rlp1, rh1, ra1 = reference_forward(params, tokens[:1], hidden, encoder_outputs)
    assert jnp.allclose(lp1, rlp1, atol=1e-5), "single-step log_probs mismatch"
    assert jnp.allclose(h1, rh1, atol=1e-5), "single-step hidden mismatch"
    assert jnp.allclose(a1, ra1, atol=1e-5), "single-step attn mismatch"

    print("KERNEL_OK")
</pallas_src>

<mosaic_0001>
module attributes {stable_mosaic.version = 11 : i64} {
  func.func @_decoder_seq_kernel(%arg0: i32, %arg1: memref<4xi32, #tpu.memory_space<smem>>, %arg2: memref<20x16xf32, #tpu.memory_space<vmem>>, %arg3: memref<1x16xf32, #tpu.memory_space<vmem>>, %arg4: memref<10x16xf32, #tpu.memory_space<vmem>>, %arg5: memref<32x128xf32, #tpu.memory_space<vmem>>, %arg6: memref<1x128xf32, #tpu.memory_space<vmem>>, %arg7: memref<4x128xf32, #tpu.memory_space<vmem>>, %arg8: memref<1x16xf32, #tpu.memory_space<vmem>>) attributes {dimension_semantics = [#tpu.dimension_semantics<arbitrary>], iteration_bounds = array<i64: 4>, scalar_prefetch = 1 : i64, scratch_operands = 1 : i64, tpu.core_type = #tpu.core_type<tc>, window_params = [{pipeline_mode = #tpu.pipeline_mode<synchronous>, transform_indices = @transform_0, window_bounds = array<i64: 20, 16>}, {pipeline_mode = #tpu.pipeline_mode<synchronous>, transform_indices = @transform_1, window_bounds = array<i64: 1, 16>}, {pipeline_mode = #tpu.pipeline_mode<synchronous>, transform_indices = @transform_2, window_bounds = array<i64: 10, 16>}, {pipeline_mode = #tpu.pipeline_mode<synchronous>, transform_indices = @transform_3, window_bounds = array<i64: 32, 128>}, {pipeline_mode = #tpu.pipeline_mode<synchronous>, transform_indices = @transform_4, window_bounds = array<i64: 1, 128>}, {pipeline_mode = #tpu.pipeline_mode<synchronous>, transform_indices = @transform_5, window_bounds = array<i64: 4, 128>}]} {
    %c0_i32 = arith.constant 0 : i32
    %0 = arith.cmpi eq, %arg0, %c0_i32 : i32
    %1 = arith.extui %0 : i1 to i32
    %c0_i32_0 = arith.constant 0 : i32
    %2 = arith.cmpi ne, %1, %c0_i32_0 : i32
    scf.if %2 {
      %c0_24 = arith.constant 0 : index
      %c0_25 = arith.constant 0 : index
      %77 = vector.load %arg3[%c0_24, %c0_25] : memref<1x16xf32, #tpu.memory_space<vmem>>, vector<1x16xf32>
      %c0_26 = arith.constant 0 : index
      %c0_27 = arith.constant 0 : index
      %78 = vector.load %arg8[%c0_26, %c0_27] : memref<1x16xf32, #tpu.memory_space<vmem>>, vector<1x16xf32>
      tpu.vector_store %arg8[%c0_26, %c0_27], %77 {strides = array<i32>} : memref<1x16xf32, #tpu.memory_space<vmem>>, vector<1x16xf32>,
    } else {
    }
    %c0 = arith.constant 0 : index
    %c0_1 = arith.constant 0 : index
    %3 = vector.load %arg5[%c0, %c0_1] : memref<32x128xf32, #tpu.memory_space<vmem>>, vector<32x128xf32>
    %c0_2 = arith.constant 0 : index
    %c0_3 = arith.constant 0 : index
    %4 = vector.load %arg6[%c0_2, %c0_3] : memref<1x128xf32, #tpu.memory_space<vmem>>, vector<1x128xf32>
    %5 = arith.index_cast %arg0 : i32 to index
    %6 = memref.load %arg1[%5] : memref<4xi32, #tpu.memory_space<smem>>
    %7 = arith.index_cast %6 : i32 to index
    %c0_4 = arith.constant 0 : index
    %8 = vector.load %arg2[%7, %c0_4] : memref<20x16xf32, #tpu.memory_space<vmem>>, vector<1x16xf32>
    %c0_5 = arith.constant 0 : index
    %c0_6 = arith.constant 0 : index
    %9 = vector.load %arg8[%c0_5, %c0_6] : memref<1x16xf32, #tpu.memory_space<vmem>>, vector<1x16xf32>
    %10 = tpu.concatenate %8, %9 in 1 : vector<1x16xf32>, vector<1x16xf32> -> vector<1x32xf32>
    %11 = vector.extract_strided_slice %3 {offsets = [0, 0], sizes = [32, 10], strides = [1, 1]} : vector<32x128xf32> to vector<32x10xf32>
    %cst = arith.constant dense<0.000000e+00> : vector<1x10xf32>
    %12 = tpu.matmul %10, %11, %cst {dimension_numbers = #tpu.dot_dimension_numbers<[1], [0], [0], [1], [0, 0, 1, 1], [], []>} : vector<1x32xf32>, vector<32x10xf32>, vector<1x10xf32> -> vector<1x10xf32>
    %13 = vector.extract_strided_slice %4 {offsets = [0, 0], sizes = [1, 10], strides = [1, 1]} : vector<1x128xf32> to vector<1x10xf32>
    %14 = arith.addf %12, %13 : vector<1x10xf32>
    %cst_7 = arith.constant dense<0xFF800000> : vector<1xf32>
    %15 = vector.multi_reduction <maximumf>, %14, %cst_7 [1] : vector<1x10xf32> to vector<1xf32>
    %16 = vector.shape_cast %15 : vector<1xf32> to vector<1x1xf32>
    %17 = vector.broadcast %16 : vector<1x1xf32> to vector<1x10xf32>
    %18 = arith.subf %14, %17 : vector<1x10xf32>
    %19 = math.exp %18 : vector<1x10xf32>
    %cst_8 = arith.constant dense<0.000000e+00> : vector<1xf32>
    %20 = vector.multi_reduction <add>, %19, %cst_8 [1] : vector<1x10xf32> to vector<1xf32>
    %21 = vector.shape_cast %20 : vector<1xf32> to vector<1x1xf32>
    %22 = tpu.reciprocal %21 : vector<1x1xf32> -> vector<1x1xf32>
    %23 = vector.broadcast %22 : vector<1x1xf32> to vector<1x10xf32>
    %24 = arith.mulf %19, %23 : vector<1x10xf32>
    %c0_9 = arith.constant 0 : index
    %c0_10 = arith.constant 0 : index
    %25 = vector.load %arg4[%c0_9, %c0_10] : memref<10x16xf32, #tpu.memory_space<vmem>>, vector<10x16xf32>
    %cst_11 = arith.constant dense<0.000000e+00> : vector<1x16xf32>
    %26 = tpu.matmul %24, %25, %cst_11 {dimension_numbers = #tpu.dot_dimension_numbers<[1], [0], [0], [1], [0, 0, 1, 1], [], []>} : vector<1x10xf32>, vector<10x16xf32>, vector<1x16xf32> -> vector<1x16xf32>
    %27 = tpu.concatenate %8, %26 in 1 : vector<1x16xf32>, vector<1x16xf32> -> vector<1x32xf32>
    %28 = vector.extract_strided_slice %3 {offsets = [0, 10], sizes = [32, 16], strides = [1, 1]} : vector<32x128xf32> to vector<32x16xf32>
    %cst_12 = arith.constant dense<0.000000e+00> : vector<1x16xf32>
    %29 = tpu.matmul %27, %28, %cst_12 {dimension_numbers = #tpu.dot_dimension_numbers<[1], [0], [0], [1], [0, 0, 1, 1], [], []>} : vector<1x32xf32>, vector<32x16xf32>, vector<1x16xf32> -> vector<1x16xf32>
    %30 = vector.extract_strided_slice %4 {offsets = [0, 10], sizes = [1, 16], strides = [1, 1]} : vector<1x128xf32> to vector<1x16xf32>
    %31 = arith.addf %29, %30 : vector<1x16xf32>
    %cst_13 = arith.constant 0.000000e+00 : f32
    %32 = vector.broadcast %cst_13 : f32 to vector<1x16xf32>
    %33 = arith.maximumf %31, %32 : vector<1x16xf32>
    %34 = tpu.concatenate %33, %9 in 1 : vector<1x16xf32>, vector<1x16xf32> -> vector<1x32xf32>
    %35 = vector.extract_strided_slice %3 {offsets = [0, 26], sizes = [32, 64], strides = [1, 1]} : vector<32x128xf32> to vector<32x64xf32>
    %cst_14 = arith.constant dense<0.000000e+00> : vector<1x64xf32>
    %36 = tpu.matmul %34, %35, %cst_14 {dimension_numbers = #tpu.dot_dimension_numbers<[1], [0], [0], [1], [0, 0, 1, 1], [], []>} : vector<1x32xf32>, vector<32x64xf32>, vector<1x64xf32> -> vector<1x64xf32>
    %37 = vector.extract_strided_slice %4 {offsets = [0, 26], sizes = [1, 64], strides = [1, 1]} : vector<1x128xf32> to vector<1x64xf32>
    %38 = arith.addf %36, %37 : vector<1x64xf32>
    %39 = vector.extract_strided_slice %38 {offsets = [0, 0], sizes = [1, 32], strides = [1, 1]} : vector<1x64xf32> to vector<1x32xf32>
    %40 = arith.negf %39 : vector<1x32xf32>
    %41 = math.exp %40 : vector<1x32xf32>
    %cst_15 = arith.constant 1.000000e+00 : f32
    %42 = vector.broadcast %cst_15 : f32 to vector<1x32xf32>
    %43 = arith.addf %42, %41 : vector<1x32xf32>
    %44 = arith.divf %42, %43 : vector<1x32xf32>
    %45 = vector.extract_strided_slice %44 {offsets = [0, 0], sizes = [1, 16], strides = [1, 1]} : vector<1x32xf32> to vector<1x16xf32>
    %46 = vector.extract_strided_slice %44 {offsets = [0, 16], sizes = [1, 16], strides = [1, 1]} : vector<1x32xf32> to vector<1x16xf32>
    %47 = vector.extract_strided_slice %38 {offsets = [0, 32], sizes = [1, 16], strides = [1, 1]} : vector<1x64xf32> to vector<1x16xf32>
    %48 = vector.extract_strided_slice %38 {offsets = [0, 48], sizes = [1, 16], strides = [1, 1]} : vector<1x64xf32> to vector<1x16xf32>
    %49 = arith.mulf %45, %48 : vector<1x16xf32>
    %50 = arith.addf %47, %49 : vector<1x16xf32>
    %51 = math.tanh %50 : vector<1x16xf32>
    %cst_16 = arith.constant 1.000000e+00 : f32
    %52 = vector.broadcast %cst_16 : f32 to vector<1x16xf32>
    %53 = arith.subf %52, %46 : vector<1x16xf32>
    %54 = arith.mulf %53, %51 : vector<1x16xf32>
    %55 = arith.mulf %46, %9 : vector<1x16xf32>
    %56 = arith.addf %54, %55 : vector<1x16xf32>
    %c0_17 = arith.constant 0 : index
    %c0_18 = arith.constant 0 : index
    %57 = vector.load %arg8[%c0_17, %c0_18] : memref<1x16xf32, #tpu.memory_space<vmem>>, vector<1x16xf32>
    tpu.vector_store %arg8[%c0_17, %c0_18], %56 {strides = array<i32>} : memref<1x16xf32, #tpu.memory_space<vmem>>, vector<1x16xf32>,
    %58 = vector.extract_strided_slice %3 {offsets = [0, 90], sizes = [16, 20], strides = [1, 1]} : vector<32x128xf32> to vector<16x20xf32>
    %cst_19 = arith.constant dense<0.000000e+00> : vector<1x20xf32>
    %59 = tpu.matmul %56, %58, %cst_19 {dimension_numbers = #tpu.dot_dimension_numbers<[1], [0], [0], [1], [0, 0, 1, 1], [], []>} : vector<1x16xf32>, vector<16x20xf32>, vector<1x20xf32> -> vector<1x20xf32>
    %60 = vector.extract_strided_slice %4 {offsets = [0, 90], sizes = [1, 20], strides = [1, 1]} : vector<1x128xf32> to vector<1x20xf32>
    %61 = arith.addf %59, %60 : vector<1x20xf32>
    %cst_20 = arith.constant dense<0xFF800000> : vector<1xf32>
    %62 = vector.multi_reduction <maximumf>, %61, %cst_20 [1] : vector<1x20xf32> to vector<1xf32>
    %63 = vector.shape_cast %62 : vector<1xf32> to vector<1x1xf32>
    %64 = vector.broadcast %63 : vector<1x1xf32> to vector<1x20xf32>
    %65 = arith.subf %61, %64 : vector<1x20xf32>
    %66 = math.exp %65 : vector<1x20xf32>
    %cst_21 = arith.constant dense<0.000000e+00> : vector<1xf32>
    %67 = vector.multi_reduction <add>, %66, %cst_21 [1] : vector<1x20xf32> to vector<1xf32>
    %68 = vector.shape_cast %67 : vector<1xf32> to vector<1x1xf32>
    %69 = math.log %68 : vector<1x1xf32>
    %70 = arith.addf %69, %63 : vector<1x1xf32>
    %71 = vector.broadcast %70 : vector<1x1xf32> to vector<1x20xf32>
    %72 = arith.subf %61, %71 : vector<1x20xf32>
    %cst_22 = arith.constant 0.000000e+00 : f32
    %73 = vector.broadcast %cst_22 : f32 to vector<1x82xf32>
    %74 = tpu.concatenate %72, %56, %24, %73 in 1 : vector<1x20xf32>, vector<1x16xf32>, vector<1x10xf32>, vector<1x82xf32> -> vector<1x128xf32>
    %75 = arith.index_cast %arg0 : i32 to index
    %c0_23 = arith.constant 0 : index
    %76 = vector.load %arg7[%75, %c0_23] : memref<4x128xf32, #tpu.memory_space<vmem>>, vector<1x128xf32>
    tpu.vector_store %arg7[%75, %c0_23], %74 {strides = array<i32>} : memref<4x128xf32, #tpu.memory_space<vmem>>, vector<1x128xf32>,
    return
  }
  func.func @transform_0(%arg0: i32, %arg1: memref<4xi32, #tpu.memory_space<smem>>) -> (i32, i32) {
    %c0_i32 = arith.constant 0 : i32
    %c0_i32_0 = arith.constant 0 : i32
    %c0_i32_1 = arith.constant 0 : i32
    return %c0_i32, %c0_i32_0 : i32, i32
  }
  func.func @transform_1(%arg0: i32, %arg1: memref<4xi32, #tpu.memory_space<smem>>) -> (i32, i32) {
    %c0_i32 = arith.constant 0 : i32
    %c0_i32_0 = arith.constant 0 : i32
    %c0_i32_1 = arith.constant 0 : i32
    return %c0_i32, %c0_i32_0 : i32, i32
  }
  func.func @transform_2(%arg0: i32, %arg1: memref<4xi32, #tpu.memory_space<smem>>) -> (i32, i32) {
    %c0_i32 = arith.constant 0 : i32
    %c0_i32_0 = arith.constant 0 : i32
    %c0_i32_1 = arith.constant 0 : i32
    return %c0_i32, %c0_i32_0 : i32, i32
  }
  func.func @transform_3(%arg0: i32, %arg1: memref<4xi32, #tpu.memory_space<smem>>) -> (i32, i32) {
    %c0_i32 = arith.constant 0 : i32
    %c0_i32_0 = arith.constant 0 : i32
    %c0_i32_1 = arith.constant 0 : i32
    return %c0_i32, %c0_i32_0 : i32, i32
  }
  func.func @transform_4(%arg0: i32, %arg1: memref<4xi32, #tpu.memory_space<smem>>) -> (i32, i32) {
    %c0_i32 = arith.constant 0 : i32
    %c0_i32_0 = arith.constant 0 : i32
    %c0_i32_1 = arith.constant 0 : i32
    return %c0_i32, %c0_i32_0 : i32, i32
  }
  func.func @transform_5(%arg0: i32, %arg1: memref<4xi32, #tpu.memory_space<smem>>) -> (i32, i32) {
    %c0_i32 = arith.constant 0 : i32
    %c0_i32_0 = arith.constant 0 : i32
    %c0_i32_1 = arith.constant 0 : i32
    return %c0_i32, %c0_i32_0 : i32, i32
  }
}

</mosaic_0001>

<bundles_post_ra>
// kernel: tpu_custom_call.1
= control target key start
LH: loop header
LB: loop body
LE: loop exit
PB: predicated region body
PF: predicated region fallthrough
CT: control target
= control target key end

     0   :  { %s1158_s0 = inlined_call_operand.vmem [shape: s32[4], index: 0, kind: input, shape index: {}]   ;;  %s1159_s1 = inlined_call_operand.vmem [shape: f32[20,16], index: 1, kind: input, shape index: {}]   ;;  %s1160_s2 = inlined_call_operand.vmem [shape: f32[1,16], index: 2, kind: input, shape index: {}]   ;;  %s1161_s3 = inlined_call_operand.vmem [shape: f32[10,16], index: 3, kind: input, shape index: {}]   ;;  %s1162_s4 = inlined_call_operand.vmem [shape: f32[32,128], index: 4, kind: input, shape index: {}]   ;;  %s1163_s5 = inlined_call_operand.vmem [shape: f32[1,128], index: 5, kind: input, shape index: {}]   ;;  %s1164_s6 = inlined_call_operand.hbm [shape: f32[4,128], index: 6, kind: output, shape index: {}]  }
   0x1   :  { %s11_s23 = sshll.u32 %s1158_s0, 4  ;;  %s12_s23 = int_to_ptr.vmem [resolvable:$true] %s11_s23 }
   0x2   :  { %s939_s24 = scalar_lea.vmem %s12_s23, 16  ;;  %p944_p1 = scmp.lt.s32.totalorder %s12_s23, %s12_s23 }
   0x3   :  { %p940_p0 = scmp.ne.s32.totalorder %s12_s23, %s939_s24  ;;  %p945_p2 = scmp.lt.s32.totalorder %s939_s24, %s939_s24 }
   0x5   :  { %p946_p3 = por %p945_p2, %p944_p1 }
   0x7   :  { %p947_p4 = pnand %p946_p3, %p940_p0 }
   0x9   :  { %950 = shalt.err (!%p947_p4)  }
   0xa   :  { %s991_s25 = smov [#allocation4]  }
   0xb   :  { %14 = dma.vmem_to_smem %s12_s23, 16, %s991_s25, [#allocation3] }
   0xc   :  { %981 = dma.done.wait [#allocation3], 16 }
   0xd   :  { %982 = vsyncadd [#allocation3], 4294967280 }
   0xe   :  { %16 = sfence }
   0xf   :  { %17 = vsyncpa [#allocation6], 0  ;;  %s1044_s26 = smov 0  }
  0x10 LB: > { %s1050_s0 = sadd.s32 4294967295, %s989_s26   ;;  %p760_p5 = scmp.ge.s32.totalorder %s989_s26, 1  ;;  %s989_s26 = sphi %s1044_s26, %s23_s26  }
  0x11   : > { %p180_p6 = scmp.lt.s32.totalorder %s989_s26, 5 }
  0x13   : > { %p181_p7 = pnand %p760_p5, %p180_p6 }
  0x14   : > { %p761_p8 = scmp.ne.s32.totalorder (!%p181_p7), %s1050_s0, 0 }
  0x15   : > { %184 = sbr.rel (%p181_p7) target bundleno = 2469 (0x9a5), region = 40 }
  0x1c   : > { %201 = sbr.rel (%p761_p8) target bundleno = 35 (0x23), region = 44  ;;  %v202_v0 = vld [vmem:[%s1160_s2] sm:$0x1] (!%p761_p8)  ;;  %vm203_vm0 = vcmask (!%p761_p8), 122880  }
  0x1d   : > { %204 = vst.msk [vmem:[#allocation2] sm:$0x1] (!%p761_p8), %vm203_vm0, %v202_v0 }
  0x23 PF: > { %v205_v2 = vld [vmem:[%s1162_s4] sm:$0xff]  ;;  %v206_v3 = vld [vmem:[%s1162_s4 + $0x8] sm:$0xff]  ;;  %s992_s9 = smov 16   ;;  %v993_v4 = vmov 0.0|0.0   ;;  %v207_v6 = vld [vmem:[%s1162_s4 + $0x10] sm:$0xff]  ;;  %vm994_vm1 = vmmov 0   ;;  %v412_v39 = vlaneseq }
  0x24   : > { %v762_v1 = vld [vmem:[#allocation2] ss:$0 sm:$0xff]  ;;  %846 = vmatprep.subr.bf16.mxu0 %v993_v4  ;;  %v847_v5 = vpack.c.bf16 %v206_v3, %v205_v2  ;;  %v208_v7 = vld [vmem:[%s1162_s4 + $0x18] sm:$0xff]  ;;  %v995_v8 = vmov 0.0   ;;  %852 = vmatprep.subr.bf16.mxu1 %v993_v4  ;;  %s210_s14 = sld [smem:[#allocation4 + %s1050_s0]]  ;;  %vm222_vm2 = vcmask 130048   ;;  %v1103_v26 = vpack.i.bf16 %v206_v3, %v205_v2 }
  0x25   : > { %219 = vrot.lane.b32.xlu0 %v762_v1, %s992_s9  ;;  %807 = vmatprep.mubr.msk.f32.mxu0 %vm994_vm1, %v995_v8  ;;  %v850_v9 = vpack.c.bf16 %v208_v7, %v207_v6  ;;  %vm224_vm3 = vcmask 261120   ;;  %v209_v13 = vld [vmem:[%s1163_s5] sm:$0x1]  ;;  %vm298_vm4 = vcmask 73728   ;;  %v311_v24 = vld [vmem:[%s1161_s3 + $0x8] sm:$0x3]  ;;  %v905_v27 = vpack.i.bf16 %v208_v7, %v207_v6 }
  0x26   : > { %848 = vmatpush3.bf16.msra.mxu0 %v847_v5  ;;  %814 = vmatprep.mubr.msk.f32.mxu1 %vm994_vm1, %v995_v8  ;;  %v310_v23 = vld [vmem:[%s1161_s3] sm:$0xff]  ;;  %vm316_vm5 = vcmask 1041408   ;;  %vm996_vm6 = vmmov 1   ;;  %s997_s24 = smov 118   ;;  %vm312_vm8 = vcmask 80896   ;;  %s998_s25 = smov 102  }
  0x27   : > { %849 = vmatprep.subr.bf16.mxu0 %v993_v4  ;;  %v853_v25 = vpack.c.bf16 %v311_v24, %v310_v23  ;;  %vm854_vm7 = vmpackc.low %vm316_vm5, %vm996_vm6  ;;  %v413_v40 = vshrl.u32 %v412_v39, 7  ;;  %s999_s27 = smov 80   ;;  %s1000_s28 = smov 32   ;;  %vm611_vm9 = vcmask 122880   ;;  %vm694_vm10 = vcmask 155648  }
  0x28   : > { %s1001_s29 = smov 112   ;;  %s1002_s30 = smov 38   ;;  %vm714_vm11 = vcmask 162816   ;;  %vm716_vm12 = vcmask 293888   ;;  %vm718_vm13 = vcmask 375808  }
  0x29   : > { %855 = vmatpush3.bf16.msk.msra.mxu1 %vm854_vm7, %v853_v25  ;;  %v414_v42 = vsub.s32 0, %v413_v40  ;;  %s1003_s7 = smov 4   ;;  %s1004_s8 = smov 36  }
  0x2a   : > { %851 = vmatpush3.bf16.msra.mxu0 %v850_v9  ;;  %s211_s17 = scalar_lea.vmem %s1159_s1, %s210_s14  ;;  %856 = vmatprep.subr.bf16.mxu1 %v993_v4  ;;  %p875_p9 = scmp.eq.s32.totalorder %s1050_s0, 3 }
  0x2b   : > { %862 = vmatprep.subr.bf16.mxu0 %v993_v4  ;;  %v1083_v10 = vld [vmem:[%s211_s17] sm:$0x1]  ;;  %v415_v44 = vrot.slane %v209_v13, %v414_v42  ;;  %s775_s11 = scalar_lea.vmem [#allocation5], %s989_s26 }
  0x97   : > { %v1085_v11 = vpop.permute.xlu0 %219 }
  0x98   : > { %v223_v12 = vsel %vm222_vm2, %v1083_v10, %v1085_v11 }
  0x99   : > { %808 = vmatmul.mubr.msk.f32.vlgmr.msra.gmra.mrb[0].mxu0 %vm224_vm3, %v223_v12 }
  0x9a   : > { %836 = vmatprep.mubr.msk.f32.mxu0 %vm994_vm1, %v995_v8 }
 0x16c   : > { %v294_v14 = vpop.f32.mrb[0].mxu0 }
 0x16d   : > { %v295_v15 = vadd.f32 %v294_v14, %v209_v13  ;;  %v809_v16 = vpop.f32.mrb[1].mxu0 }
 0x16f   : > { %v299_v17 = vsel %vm298_vm4, %v295_v15, -inf }
 0x170   : > { %300 = vmax.xlane.f32.xlu0 %v299_v17 }
 0x186   : > { %916 = vrot.lane.b32.xlu0 %v905_v27, %s998_s25 }
 0x1fd   : > { %v301_v18 = vpop.xlane.xlu0 %300 }
 0x1fe   : > { %v302_v19 = vsub.f32 %v295_v15, %v301_v18 }
 0x200   : > { %v303_v20 = vmul.f32 1.442695, %v302_v19 }
 0x201   : > { %v917_v47 = vpop.permute.xlu0 %916 }
 0x202   : > { %925 = vpow2.f32 %v303_v20  ;;  %v919_v51 = vunpack.i.h.bf16 %v917_v47  ;;  %v918_v52 = vunpack.i.l.bf16 %v917_v47 }
 0x204   : > { %v866_v54 = vpack.c.bf16 %v919_v51, %v918_v52 }
 0x20c   : > { %v926_v21 = vpop.eup %925 }
 0x20d   : > { %v305_v22 = vsel %vm298_vm4, %v926_v21, 0.0 }
 0x20e   : > { %306 = vadd.xlane.f32.xlu1 %v305_v22 }
 0x21f   : > { %901 = vrot.lane.b32.xlu1 %v1103_v26, %s997_s24 }
 0x223   : > { %906 = vrot.lane.b32.xlu1 %v905_v27, %s997_s24 }
 0x29b   : > { %v307_v28 = vpop.xlane.xlu1 %306 }
 0x29c   : > { %927 = vrcp.f32 %v307_v28 }
 0x29f   : > { %v902_v31 = vpop.permute.xlu1 %901 }
 0x2a0   : > { %v904_v32 = vunpack.i.h.bf16 %v902_v31  ;;  %v903_v33 = vunpack.i.l.bf16 %v902_v31 }
 0x2a2   : > { %v857_v34 = vpack.c.bf16 %v904_v32, %v903_v33 }
 0x2a3   : > { %v907_v35 = vpop.permute.xlu1 %906 }
 0x2a4   : > { %v909_v36 = vunpack.i.h.bf16 %v907_v35  ;;  %v908_v37 = vunpack.i.l.bf16 %v907_v35 }
 0x2a6   : > { %v928_v29 = vpop.eup %927  ;;  %v860_v38 = vpack.c.bf16 %v909_v36, %v908_v37 }
 0x2a7   : > { %v1108_v30 = vmul.f32 %v928_v29, %v926_v21 }
 0x2a9   : > { %815 = vmatmul.mubr.msk.f32.vlgmr.msra.gmra.mrb[0].mxu1 %vm312_vm8, %v1108_v30 }
 0x2aa   : > { %825 = vmatprep.mubr.msk.f32.mxu1 %vm994_vm1, %v995_v8  ;;  %858 = vmatpush3.bf16.msra.mxu1 %v857_v34 }
 0x2ab   : > { %859 = vmatprep.subr.bf16.mxu1 %v993_v4 }
 0x2ae   : > { %861 = vmatpush3.bf16.msra.mxu1 %v860_v38 }
 0x2af   : > { %868 = vmatprep.subr.bf16.mxu1 %v993_v4 }
 0x37c   : > { %v386_v41 = vpop.f32.mrb[0].mxu1 }
 0x37d   : > { %391 = vrot.lane.b32.xlu1 %v386_v41, %s992_s9  ;;  %v816_v43 = vpop.f32.mrb[1].mxu1  ;;  %s1005_s9 = smov [#allocation5]  }
 0x37e   : > { %s729_s10 = sshll.u32 %s1005_s9, 4  ;;  %s730_s10 = int_to_ptr.vmem [resolvable:$true] %s729_s10 }
 0x37f   : > { %s951_s12 = scalar_lea.vmem %s730_s10, 64  ;;  %p958_p13 = scmp.lt.s32.totalorder %s730_s10, %s730_s10 }
 0x380   : > { %p952_p10 = scmp.ne.s32.totalorder %s730_s10, %s951_s12  ;;  %p959_p0 = scmp.lt.s32.totalorder %s951_s12, %s951_s12 }
 0x381   : > { %911 = vrot.lane.b32.xlu1 %v1103_v26, %s998_s25 }
 0x382   : > { %p953_p11 = pnand %p952_p10, %p875_p9  ;;  %p960_p1 = por %p959_p0, %p958_p13 }
 0x384   : > { %p954_p12 = pneg %p953_p11 }
 0x385   : > { %416 = vrot.lane.b32.xlu1 %v415_v44, %s997_s24 }
 0x386   : > { %p961_p2 = pnand %p960_p1, %p954_p12 }
 0x389   : > { %506 = vrot.lane.b32.xlu1 %v415_v44, %s998_s25 }
 0x3ef   : > { %v392_v45 = vpop.permute.xlu1 %391 }
 0x3f0   : > { %v394_v46 = vsel %vm222_vm2, %v1083_v10, %v392_v45 }
 0x3f1   : > { %826 = vmatmul.mubr.msk.f32.vlgmr.msra.gmra.mrb[2].mxu1 %vm224_vm3, %v394_v46 }
 0x3f2   : > { %843 = vmatprep.mubr.msk.f32.mxu1 %vm994_vm1, %v995_v8 }
 0x3f3   : > { %v912_v48 = vpop.permute.xlu1 %911 }
 0x3f4   : > { %v914_v49 = vunpack.i.h.bf16 %v912_v48  ;;  %v913_v50 = vunpack.i.l.bf16 %v912_v48 }
 0x3f6   : > { %v863_v53 = vpack.c.bf16 %v914_v49, %v913_v50 }
 0x3f7   : > { %v417_v55 = vpop.permute.xlu1 %416 }
 0x3f8   : > { %864 = vmatpush3.bf16.msra.mxu0 %v863_v53 }
 0x3f9   : > { %865 = vmatprep.subr.bf16.mxu0 %v993_v4 }
 0x3fb   : > { %v507_v61 = vpop.permute.xlu1 %506 }
 0x3fc   : > { %867 = vmatpush3.bf16.msra.mxu0 %v866_v54 }
 0x4c4   : > { %v488_v56 = vpop.f32.mrb[2].mxu1 }
 0x4c5   : > { %v489_v57 = vadd.f32 %v488_v56, %v417_v55  ;;  %v827_v58 = vpop.f32.mrb[3].mxu1 }
 0x4c7   : > { %v492_v59 = vmax.f32 %v489_v57, 0.0 }
 0x4c9   : > { %v493_v60 = vsel %vm222_vm2, %v492_v59, %v1085_v11 }
 0x4ca   : > { %837 = vmatmul.mubr.msk.f32.vlgmr.msra.gmra.mrb[2].mxu0 %vm224_vm3, %v493_v60 }
 0x59d   : > { %v578_v62 = vpop.f32.mrb[2].mxu0 }
 0x59e   : > { %v579_v63 = vadd.f32 %v578_v62, %v507_v61  ;;  %v838_v0 = vpop.f32.mrb[3].mxu0 }
 0x5a0   : > { %589 = vrot.lane.b32.xlu1 %v579_v63, %s999_s27  ;;  %v768_v1 = vmul.f32 -1.442695, %v579_v63 }
 0x5a2   : > { %929 = vpow2.f32 %v768_v1 }
 0x5ac   : > { %v930_v2 = vpop.eup %929 }
 0x5ad   : > { %v585_v3 = vadd.f32 1.0, %v930_v2 }
 0x5af   : > { %931 = vrcp.f32 %v585_v3 }
 0x5b9   : > { %v932_v4 = vpop.eup %931 }
 0x5ba   : > { %v599_v10 = vsub.f32 1.0, %v932_v4  ;;  %v605_v13 = vmul.f32 %v932_v4, %v1085_v11 }
 0x612   : > { %v590_v5 = vpop.permute.xlu1 %589 }
 0x613   : > { %v592_v6 = vmul.f32 %v932_v4, %v590_v5 }
 0x615   : > { %594 = vrot.lane.b32.xlu1 %v592_v6, %s1000_s28 }
 0x687   : > { %v595_v7 = vpop.permute.xlu1 %594 }
 0x688   : > { %v597_v8 = vadd.f32 %v595_v7, %v579_v63 }
 0x68a   : > { %933 = vtanh.f32 %v597_v8 }
 0x694   : > { %v934_v9 = vpop.eup %933 }
 0x695   : > { %601 = vrot.lane.b32.xlu1 %v934_v9, %s1001_s29 }
 0x699   : > { %921 = vrot.lane.b32.xlu1 %v1103_v26, %s1002_s30 }
 0x69d   : > { %619 = vrot.lane.b32.xlu1 %v415_v44, %s1002_s30 }
 0x707   : > { %v602_v12 = vpop.permute.xlu1 %601 }
 0x708   : > { %v604_v14 = vmul.f32 %v602_v12, %v599_v10 }
 0x70a   : > { %v606_v15 = vadd.f32 %v605_v13, %v604_v14 }
 0x70b   : > { %v922_v16 = vpop.permute.xlu1 %921 }
 0x70c   : > { %608 = vrot.lane.b32.xlu0 %v606_v15, %s1001_s29  ;;  %v924_v17 = vunpack.i.h.bf16 %v922_v16  ;;  %v923_v18 = vunpack.i.l.bf16 %v922_v16 }
 0x70e   : > { %v869_v19 = vpack.c.bf16 %v924_v17, %v923_v18 }
 0x70f   : > { %v620_v21 = vpop.permute.xlu1 %619 }
 0x710   : > { %870 = vmatpush3.bf16.msra.mxu1 %v869_v19 }
 0x77e   : > { %v609_v20 = vpop.permute.xlu0 %608 }
 0x77f   : > { %612 = vst.msk [vmem:[#allocation2] sm:$0x1] %vm611_vm9, %v609_v20  ;;  %844 = vmatmul.mubr.msk.f32.vlgmr.msra.gmra.mrb[4].mxu1 %vm222_vm2, %v609_v20 }
 0x852   : > { %v690_v22 = vpop.f32.mrb[4].mxu1 }
 0x853   : > { %v691_v23 = vadd.f32 %v690_v22, %v620_v21  ;;  %v845_v24 = vpop.f32.mrb[5].mxu1 }
 0x855   : > { %v695_v25 = vsel %vm694_vm10, %v691_v23, -inf }
 0x856   : > { %696 = vmax.xlane.f32.xlu0 %v695_v25 }
 0x86c   : > { %708 = vrot.lane.b32.xlu0 %v606_v15, %s1003_s7 }
 0x8e3   : > { %v697_v11 = vpop.xlane.xlu0 %696 }
 0x8e4   : > { %v698_v26 = vsub.f32 %v691_v23, %v697_v11 }
 0x8e6   : > { %v699_v27 = vmul.f32 1.442695, %v698_v26 }
 0x8e7   : > { %v709_v36 = vpop.permute.xlu0 %708 }
 0x8e8   : > { %935 = vpow2.f32 %v699_v27 }
 0x8f2   : > { %v936_v28 = vpop.eup %935 }
 0x8f3   : > { %v701_v29 = vsel %vm694_vm10, %v936_v28, 0.0 }
 0x8f4   : > { %702 = vadd.xlane.f32.xlu1 %v701_v29 }
 0x905   : > { %711 = vrot.lane.b32.xlu1 %v1108_v30, %s1004_s8 }
 0x981   : > { %v703_v31 = vpop.xlane.xlu1 %702 }
 0x982   : > { %937 = vlog2.f32 %v703_v31 }
 0x985   : > { %v712_v37 = vpop.permute.xlu1 %711 }
 0x98c   : > { %v938_v32 = vpop.eup %937 }
 0x98d   : > { %v705_v33 = vmul.f32 0.6931472, %v938_v32 }
 0x98f   : > { %v706_v34 = vadd.f32 %v705_v33, %v697_v11 }
 0x991   : > { %v707_v35 = vsub.f32 %v691_v23, %v706_v34 }
 0x993   : > { %v715_v38 = vsel %vm714_vm11, %v707_v35, %v709_v36 }
 0x994   : > { %v717_v39 = vsel %vm716_vm12, %v715_v38, %v712_v37 }
 0x995   : > { %v719_v30 = vsel %vm718_vm13, %v717_v39, 0.0 }
 0x996   : > { %777 = vst [vmem:[%s775_s11 - $0x1] sm:$0x1] %v719_v30 }
 0x997   : > { %964 = shalt.err (!%p961_p2)
}
 0x998   : > { %s965_s15 = scalar_lea.hbm %s1164_s6, 64 }
 0x999   : > { %p966_p3 = scmp.ne.s32.totalorder %s1164_s6, %s965_s15  ;;  %p971_p6 = scmp.lt.u32.totalorder %s965_s15, %s1164_s6 }
 0x99b   : > { %p967_p4 = pnand %p966_p3, %p875_p9 }
 0x99d   : > { %p968_p5 = pneg %p967_p4 }
 0x99f   : > { %p973_p7 = pnand %p971_p6, %p968_p5 }
 0x9a1   : > { %976 = shalt.err (!%p973_p7)
}
 0x9a2   : > { %872 = dma.vmem_to_hbm [thread:$0]  (%p875_p9), %s730_s10, 64, %s1164_s6, [#allocation6]  }
 0x9a3   : > { %984 = dma.done.wait (%p875_p9), [#allocation6], 64  }
 0x9a4   : > { %986 = vsyncadd (%p875_p9), [#allocation6], 4294967232 }
 0x9a5 PF: > { %s23_s26 = sadd.s32 1, %s989_s26  }
 0x9a6   : > { %p20_p8 = scmp.ge.s32.totalorder %s23_s26, 6  }
 0x9a8   :  { %22 = sbr.rel (!%p20_p8) target bundleno = 16 (0x10), region = 70 }
 0x9af   :  { %742 = vsyncpa [#allocation6], 1 }
 0x9b0   :  { %744 = vsyncpa [#allocation6 + $0x1], 1 }

</bundles_post_ra>
